<compile_context>
chip_gen: v7x
topology: tpu7x:2x2x1
jax: 0.10.0
libtpu: 0.0.40
codegen_flags: <defaults>
</compile_context>

<pallas_src>
import jax
import jax.numpy as jnp
from jax.experimental import pallas as pl
from jax.experimental.pallas import tpu as pltpu

LANE = 128      # vreg lane width (same on v5e / v6e / v7x)
SUBLANE = 8     # f32 sublane count
TM_MAX = 512    # max batch rows per block before switching to a tiled grid


def _round_up(n, m):
    return ((n + m - 1) // m) * m


def linear_kernel(x_ref, w_ref, b_ref, o_ref):
    # MXU matmul with f32 accumulation, bias add on the f32 accumulator,
    # single cast at the end.  All operands are lane/sublane aligned.
    acc = jnp.dot(x_ref[...], w_ref[...], preferred_element_type=jnp.float32)
    o_ref[...] = (acc + b_ref[...]).astype(o_ref.dtype)


def linear_pallas(x, weight, bias):
    """y = x @ weight.T + bias  (torch.nn.Linear semantics).

    x:      (B, Din)
    weight: (Dout, Din)
    bias:   (Dout,)
    """
    B, Din = x.shape
    Dout = weight.shape[0]

    # Pad to lane/sublane-dense shapes so the kernel uses unmasked vld/vst.
    Bp = _round_up(max(B, SUBLANE), SUBLANE)
    Dinp = _round_up(max(Din, LANE), LANE)
    Doutp = _round_up(max(Dout, LANE), LANE)

    x_p = jnp.zeros((Bp, Dinp), x.dtype).at[:B, :Din].set(x)
    # Pre-transpose weight so the kernel computes x @ W^T directly.
    w_t_p = jnp.zeros((Dinp, Doutp), weight.dtype).at[:Din, :Dout].set(weight.T)
    b_p = jnp.zeros((1, Doutp), bias.dtype).at[0, :Dout].set(bias)

    cost = pl.CostEstimate(
        flops=2 * Bp * Dinp * Doutp,
        transcendentals=0,
        bytes_accessed=4 * (Bp * Dinp + Dinp * Doutp + Doutp + Bp * Doutp),
    )

    if Bp <= TM_MAX:
        # Small batch: single VMEM-resident block, no grid / pipeline overhead.
        y_p = pl.pallas_call(
            linear_kernel,
            out_shape=jax.ShapeDtypeStruct((Bp, Doutp), x.dtype),
            in_specs=[
                pl.BlockSpec(memory_space=pltpu.MemorySpace.VMEM),
                pl.BlockSpec(memory_space=pltpu.MemorySpace.VMEM),
                pl.BlockSpec(memory_space=pltpu.MemorySpace.VMEM),
            ],
            out_specs=pl.BlockSpec(memory_space=pltpu.MemorySpace.VMEM),
            cost_estimate=cost,
        )(x_p, w_t_p, b_p)
    else:
        # Large batch: tile the batch axis; weight/bias blocks stay resident.
        tm = TM_MAX
        Bp = _round_up(Bp, tm)
        if Bp > x_p.shape[0]:
            x_p = jnp.zeros((Bp, Dinp), x.dtype).at[:B, :Din].set(x)
        y_p = pl.pallas_call(
            linear_kernel,
            out_shape=jax.ShapeDtypeStruct((Bp, Doutp), x.dtype),
            grid_spec=pltpu.PrefetchScalarGridSpec(
                num_scalar_prefetch=0,
                grid=(Bp // tm,),
                in_specs=[
                    pl.BlockSpec((tm, Dinp), lambda i: (i, 0)),
                    pl.BlockSpec((Dinp, Doutp), lambda i: (0, 0)),
                    pl.BlockSpec((1, Doutp), lambda i: (0, 0)),
                ],
                out_specs=pl.BlockSpec((tm, Doutp), lambda i: (i, 0)),
            ),
            compiler_params=pltpu.CompilerParams(
                dimension_semantics=("parallel",)
            ),
            cost_estimate=cost,
        )(x_p, w_t_p, b_p)

    # Strip padding outside the kernel (fused by XLA).
    return y_p[:B, :Dout]


if __name__ == "__main__":
    in_features = 10
    out_features = 10
    batch = 8

    key = jax.random.PRNGKey(0)
    kx, kw, kb = jax.random.split(key, 3)

    # Deterministic parameter init (PyTorch-like uniform(-1/sqrt(fan_in), ...)).
    bound = 1.0 / jnp.sqrt(jnp.float32(in_features))
    weight = jax.random.uniform(
        kw, (out_features, in_features), jnp.float32, -bound, bound
    )
    bias = jax.random.uniform(kb, (out_features,), jnp.float32, -bound, bound)

    x = jax.random.normal(kx, (batch, in_features), jnp.float32)

    y = linear_pallas(x, weight, bias)
    jax.block_until_ready(y)

    # Pure-JAX reference check (torch semantics: y = x @ W^T + b).
    y_ref = x @ weight.T + bias
    assert y.shape == y_ref.shape, "shape mismatch vs reference"
    assert jnp.allclose(y, y_ref, atol=1e-5, rtol=1e-5), "mismatch vs reference"

    print("KERNEL_OK")
</pallas_src>

<mosaic_0001>
module attributes {stable_mosaic.version = 11 : i64} {
  func.func @linear_kernel(%arg0: memref<8x128xf32, #tpu.memory_space<vmem>>, %arg1: memref<128x128xf32, #tpu.memory_space<vmem>>, %arg2: memref<1x128xf32, #tpu.memory_space<vmem>>, %arg3: memref<8x128xf32, #tpu.memory_space<vmem>>) attributes {dimension_semantics = [], scalar_prefetch = 0 : i64, scratch_operands = 0 : i64, tpu.core_type = #tpu.core_type<tc>} {
    %c0 = arith.constant 0 : index
    %c0_0 = arith.constant 0 : index
    %0 = vector.load %arg0[%c0, %c0_0] : memref<8x128xf32, #tpu.memory_space<vmem>>, vector<8x128xf32>
    %c0_1 = arith.constant 0 : index
    %c0_2 = arith.constant 0 : index
    %1 = vector.load %arg1[%c0_1, %c0_2] : memref<128x128xf32, #tpu.memory_space<vmem>>, vector<128x128xf32>
    %cst = arith.constant dense<0.000000e+00> : vector<8x128xf32>
    %2 = tpu.matmul %0, %1, %cst {dimension_numbers = #tpu.dot_dimension_numbers<[1], [0], [0], [1], [0, 0, 1, 1], [], []>} : vector<8x128xf32>, vector<128x128xf32>, vector<8x128xf32> -> vector<8x128xf32>
    %c0_3 = arith.constant 0 : index
    %c0_4 = arith.constant 0 : index
    %3 = vector.load %arg2[%c0_3, %c0_4] : memref<1x128xf32, #tpu.memory_space<vmem>>, vector<1x128xf32>
    %4 = vector.broadcast %3 : vector<1x128xf32> to vector<8x128xf32>
    %5 = arith.addf %2, %4 : vector<8x128xf32>
    %c0_5 = arith.constant 0 : index
    %c0_6 = arith.constant 0 : index
    %6 = vector.load %arg3[%c0_5, %c0_6] : memref<8x128xf32, #tpu.memory_space<vmem>>, vector<8x128xf32>
    tpu.vector_store %arg3[%c0_5, %c0_6], %5 {strides = array<i32>} : memref<8x128xf32, #tpu.memory_space<vmem>>, vector<8x128xf32>,
    return
  }
}

</mosaic_0001>

<bundles_post_ra>
// kernel: tpu_custom_call.1
= control target key start
LH: loop header
LB: loop body
LE: loop exit
PB: predicated region body
PF: predicated region fallthrough
CT: control target
= control target key end

     0   :  { %8 = vsyncpa [#allocation3], 0  ;;  %s383_s0 = inlined_call_operand.hbm [shape: f32[8,128], index: 0, kind: input, shape index: {}]   ;;  %s384_s1 = inlined_call_operand.hbm [shape: f32[128,128], index: 1, kind: input, shape index: {}]   ;;  %s385_s2 = inlined_call_operand.vmem [shape: f32[1,128], index: 2, kind: input, shape index: {}]   ;;  %s386_s3 = inlined_call_operand.hbm [shape: f32[8,128], index: 3, kind: output, shape index: {}]  }
   0x1   :  { %9 = vsyncpa [#allocation6], 0 }
   0x2   :  { %10 = vsyncpa [#allocation4], 0  ;;  %s309_s12 = smov [#allocation2]   ;;  %s310_s14 = smov [#allocation5]  }
   0x3   :  { %s17_s13 = sshll.u32 %s309_s12, 4  ;;  %s26_s15 = sshll.u32 %s310_s14, 4  ;;  %s18_s13 = int_to_ptr.vmem [resolvable:$true] %s17_s13  ;;  %s337_s15 = int_to_ptr.vmem [resolvable:$true] %s26_s15 }
   0x4   :  { %s237_s18 = scalar_lea.hbm %s383_s0, 128 }
   0x5   :  { %p238_p0 = scmp.ne.s32.totalorder %s383_s0, %s237_s18  ;;  %p241_p1 = scmp.lt.u32.totalorder %s237_s18, %s383_s0 }
   0x7   :  { %p243_p2 = pnand %p241_p1, %p238_p0 }
   0x9   :  { %246 = shalt.err (!%p243_p2)
}
   0xa   :  { %s247_s23 = scalar_lea.vmem %s18_s13, 128  ;;  %p252_p4 = scmp.lt.s32.totalorder %s18_s13, %s18_s13 }
   0xb   :  { %p248_p3 = scmp.ne.s32.totalorder %s18_s13, %s247_s23  ;;  %p253_p5 = scmp.lt.s32.totalorder %s247_s23, %s247_s23 }
   0xd   :  { %p254_p6 = por %p253_p5, %p252_p4 }
   0xf   :  { %p255_p7 = pnand %p254_p6, %p248_p3 }
  0x11   :  { %258 = shalt.err (!%p255_p7)
}
  0x12   :  { %20 = dma.hbm_to_vmem [thread:$0]  %s383_s0, 128, %s18_s13, [#allocation3]  }
  0x13   :  { %s259_s28 = scalar_lea.hbm %s384_s1, 2048 }
  0x14   :  { %p260_p8 = scmp.ne.s32.totalorder %s384_s1, %s259_s28  ;;  %p263_p9 = scmp.lt.u32.totalorder %s259_s28, %s384_s1 }
  0x16   :  { %p265_p10 = pnand %p263_p9, %p260_p8 }
  0x18   :  { %268 = shalt.err (!%p265_p10)
}
  0x19   :  { %s269_s6 = scalar_lea.vmem %s337_s15, 2048  ;;  %p274_p12 = scmp.lt.s32.totalorder %s337_s15, %s337_s15 }
  0x1a   :  { %p270_p11 = scmp.ne.s32.totalorder %s337_s15, %s269_s6  ;;  %p275_p13 = scmp.lt.s32.totalorder %s269_s6, %s269_s6 }
  0x1c   :  { %p276_p0 = por %p275_p13, %p274_p12 }
  0x1e   :  { %p277_p1 = pnand %p276_p0, %p270_p11 }
  0x20   :  { %280 = shalt.err (!%p277_p1)
}
  0x21   :  { %s311_s0 = smov 128   ;;  %s312_s7 = smov 8  }
  0x22   :  { %32 = dma.hbm_to_vmem [thread:$0]  %s384_s1, 2048, %s337_s15, [#allocation6], %s311_s0, %s311_s0, %s312_s7  }
  0x23   :  { %303 = dma.done.wait [#allocation3], 128  }
  0x24   :  { %304 = vsyncadd [#allocation3], 4294967168 }
  0x25   :  { %305 = dma.done.wait [#allocation6], 2048  }
  0x26   :  { %306 = vsyncadd [#allocation6], 4294965248  ;;  %v313_v0 = vmov 0.0|0.0   ;;  %vm314_vm0 = vmmov 0   ;;  %v315_v1 = vmov 0.0   ;;  %v42_v2 = vld [vmem:[#allocation5] sm:$0xff] }
  0x27   :  { %205 = vmatprep.subr.bf16.mxu0 %v313_v0  ;;  %202 = vmatprep.mubr.msk.f32.mxu0 %vm314_vm0, %v315_v1  ;;  %v43_v3 = vld [vmem:[#allocation5 + $0x8] sm:$0xff]  ;;  %v44_v4 = vld [vmem:[#allocation5 + $0x10] sm:$0xff]  ;;  %v45_v6 = vld [vmem:[#allocation5 + $0x18] sm:$0xff]  ;;  %s316_s11 = smov [#allocation7]  }
  0x28   :  { %v206_v5 = vpack.c.bf16 %v43_v3, %v42_v2  ;;  %v209_v7 = vpack.c.bf16 %v45_v6, %v44_v4  ;;  %v46_v8 = vld [vmem:[#allocation5 + $0x20] sm:$0xff]  ;;  %v47_v9 = vld [vmem:[#allocation5 + $0x28] sm:$0xff]  ;;  %v48_v11 = vld [vmem:[#allocation5 + $0x30] sm:$0xff]  ;;  %s142_s12 = sshll.u32 %s316_s11, 4  ;;  %s143_s12 = int_to_ptr.vmem [resolvable:$true] %s142_s12 }
  0x29   :  { %v212_v10 = vpack.c.bf16 %v47_v9, %v46_v8  ;;  %v49_v12 = vld [vmem:[#allocation5 + $0x38] sm:$0xff]  ;;  %v50_v14 = vld [vmem:[#allocation5 + $0x40] sm:$0xff]  ;;  %v51_v15 = vld [vmem:[#allocation5 + $0x48] sm:$0xff]  ;;  %s281_s13 = scalar_lea.vmem %s143_s12, 128  ;;  %p286_p3 = scmp.lt.s32.totalorder %s143_s12, %s143_s12 }
  0x2a   :  { %207 = vmatpush3.bf16.msra.mxu0 %v206_v5  ;;  %v215_v13 = vpack.c.bf16 %v49_v12, %v48_v11  ;;  %v218_v16 = vpack.c.bf16 %v51_v15, %v50_v14  ;;  %v52_v17 = vld [vmem:[#allocation5 + $0x50] sm:$0xff]  ;;  %v53_v18 = vld [vmem:[#allocation5 + $0x58] sm:$0xff]  ;;  %v54_v20 = vld [vmem:[#allocation5 + $0x60] sm:$0xff]  ;;  %p282_p2 = scmp.ne.s32.totalorder %s143_s12, %s281_s13  ;;  %p287_p4 = scmp.lt.s32.totalorder %s281_s13, %s281_s13 }
  0x2b   :  { %208 = vmatprep.subr.bf16.mxu0 %v313_v0  ;;  %v221_v19 = vpack.c.bf16 %v53_v18, %v52_v17  ;;  %v55_v21 = vld [vmem:[#allocation5 + $0x68] sm:$0xff]  ;;  %v56_v23 = vld [vmem:[#allocation5 + $0x70] sm:$0xff]  ;;  %v57_v24 = vld [vmem:[#allocation5 + $0x78] sm:$0xff] }
  0x2c   :  { %v224_v22 = vpack.c.bf16 %v55_v21, %v54_v20  ;;  %v227_v25 = vpack.c.bf16 %v57_v24, %v56_v23  ;;  %v41_v26 = vld [vmem:[#allocation2] sm:$0xff]  ;;  %p288_p5 = por %p287_p4, %p286_p3 }
  0x2d   :  { %v152_v27 = vld [vmem:[%s385_s2] ss:$0 sm:$0xff] }
  0x2e   :  { %210 = vmatpush3.bf16.msra.mxu0 %v209_v7  ;;  %p289_p6 = pnand %p288_p5, %p282_p2 }
  0x2f   :  { %211 = vmatprep.subr.bf16.mxu0 %v313_v0 }
  0x32   :  { %213 = vmatpush3.bf16.msra.mxu0 %v212_v10 }
  0x33   :  { %214 = vmatprep.subr.bf16.mxu0 %v313_v0 }
  0x36   :  { %216 = vmatpush3.bf16.msra.mxu0 %v215_v13 }
  0x37   :  { %217 = vmatprep.subr.bf16.mxu0 %v313_v0 }
  0x3a   :  { %219 = vmatpush3.bf16.msra.mxu0 %v218_v16 }
  0x3b   :  { %220 = vmatprep.subr.bf16.mxu0 %v313_v0 }
  0x3e   :  { %222 = vmatpush3.bf16.msra.mxu0 %v221_v19 }
  0x3f   :  { %223 = vmatprep.subr.bf16.mxu0 %v313_v0 }
  0x42   :  { %225 = vmatpush3.bf16.msra.mxu0 %v224_v22 }
  0x43   :  { %226 = vmatprep.subr.bf16.mxu0 %v313_v0 }
  0x46   :  { %228 = vmatpush3.bf16.msra.mxu0 %v227_v25 }
  0x49   :  { %203 = vmatmul.mubr.f32.vlgmr.msra.gmra.mrb[0].mxu0 %v41_v26 }
 0x11c   :  { %v131_v28 = vpop.f32.mrb[0].mxu0 }
 0x11d   :  { %v132_v29 = vadd.f32 %v152_v27, %v131_v28  ;;  %v204_v30 = vpop.f32.mrb[1].mxu0 }
 0x11f   :  { %135 = vst [vmem:[#allocation7] sm:$0xff] %v132_v29 }
 0x120   :  { %292 = shalt.err (!%p289_p6)
}
 0x121   :  { %s293_s16 = scalar_lea.hbm %s386_s3, 128 }
 0x122   :  { %p294_p7 = scmp.ne.s32.totalorder %s386_s3, %s293_s16  ;;  %p297_p8 = scmp.lt.u32.totalorder %s293_s16, %s386_s3 }
 0x124   :  { %p299_p9 = pnand %p297_p8, %p294_p7 }
 0x126   :  { %302 = shalt.err (!%p299_p9)
}
 0x127   :  { %145 = dma.vmem_to_hbm [thread:$0]  %s143_s12, 128, %s386_s3, [#allocation4]  }
 0x128   :  { %307 = dma.done.wait [#allocation4], 128  }
 0x129   :  { %308 = vsyncadd [#allocation4], 4294967168 }
 0x12a   :  { %149 = vsyncpa [#allocation3], 1 }
 0x12b   :  { %150 = vsyncpa [#allocation6], 1 }
 0x12c   :  { %151 = vsyncpa [#allocation4], 1 }

</bundles_post_ra>
